<compile_context>
chip_gen: v5e
topology: v5e:2x2
jax: 0.10.0
libtpu: 0.0.40
codegen_flags: <defaults>
</compile_context>

<pallas_src>
import functools

import jax
import jax.numpy as jnp
from jax.experimental import pallas as pl
from jax.experimental.pallas import tpu as pltpu


def _round_up(x, m):
    return (x + m - 1) // m * m


def _physical_vmem_bytes():
    """Per-core VMEM capacity; conservative fallback (v7x = 64 MiB / TC)."""
    try:
        return int(pltpu.get_tpu_info().vmem_capacity_bytes)
    except Exception:
        return 64 * 1024 * 1024


def _const_spec(shape):
    """BlockSpec for a block whose index never changes: single-buffer it."""
    idx = lambda i, k: (0, 0)
    try:
        return pl.BlockSpec(shape, idx, pipeline_mode=pl.Buffered(1))
    except TypeError:  # older pallas without the pipeline_mode kwarg
        return pl.BlockSpec(shape, idx)


def mlp_kernel(x_ref, w1_ref, b1_ref, w2_ref, b2_ref, o_ref, acc_ref):
    k = pl.program_id(1)

    # Partial first matmul: bf16 in, f32 accumulate on the MXU.
    partial_acc = jnp.dot(x_ref[...], w1_ref[...],
                          preferred_element_type=jnp.float32)

    @pl.when(k == 0)
    def _():
        acc_ref[...] = partial_acc        # first K step: plain store, no zero+RMW

    @pl.when(k != 0)
    def _():
        acc_ref[...] += partial_acc

    @pl.when(k == pl.num_programs(1) - 1)
    def _():
        # bias + ReLU in f32 on the VPU, then second matmul (bf16 in, f32 out).
        h = jnp.maximum(acc_ref[...] + b1_ref[...], 0.0)
        out = jnp.dot(h.astype(w2_ref.dtype), w2_ref[...],
                      preferred_element_type=jnp.float32)
        o_ref[...] = (out + b2_ref[...]).astype(o_ref.dtype)


def prepare_net_params(w1, b1, w2, b2, *, k_tile=1024):
    """Pad + cast the weights ONCE (outside the per-call forward).

    w1: [IN, H]   b1: [H] or [1, H]   w2: [H, O]   b2: [O] or [1, O]
    (weights pre-transposed vs. torch.nn.Linear's [out, in] layout)
    """
    IN, H = w1.shape
    O = w2.shape[-1]

    TK = min(_round_up(k_tile, 128), _round_up(IN, 128))
    INp = _round_up(IN, TK)
    Hp = _round_up(H, 128)
    Op = _round_up(O, 128)  # lane-dense output slab (unmasked vst)

    # Zero padding is mathematically inert through both matmuls, bias adds and ReLU.
    w1p = jnp.zeros((INp, Hp), jnp.bfloat16).at[:IN, :H].set(
        jnp.asarray(w1, jnp.bfloat16))
    b1p = jnp.zeros((1, Hp), jnp.float32).at[:, :H].set(
        jnp.asarray(b1, jnp.float32).reshape(1, H))
    w2p = jnp.zeros((Hp, Op), jnp.bfloat16).at[:H, :O].set(
        jnp.asarray(w2, jnp.bfloat16))
    b2p = jnp.zeros((1, Op), jnp.float32).at[:, :O].set(
        jnp.asarray(b2, jnp.float32).reshape(1, O))

    return (w1p, b1p, w2p, b2p), {"n_out": O, "tk": TK}


@functools.partial(jax.jit, static_argnames=("n_out", "tk", "batch_tile"))
def net_forward_padded(x, w1p, b1p, w2p, b2p, *, n_out, tk, batch_tile=512):
    """out = relu(x @ w1 + b1) @ w2 + b2 with pre-padded bf16 weights."""
    B, IN = x.shape
    INp, Hp = w1p.shape
    Op = w2p.shape[1]
    TK = tk

    # Batch tile: multiple of 16 (bf16 packs 2 rows/sublane); ensure >= 2 batch
    # tiles whenever possible so the "parallel" axis shards across v7x's 2 TCs.
    B16 = _round_up(B, 16)
    TB = min(_round_up(batch_tile, 16), B16)
    if B16 >= 32 and B16 // TB < 2:
        TB = _round_up(B16 // 2, 16)

    # VMEM budget: clamp to physical capacity (64 MiB v7x / 128 MiB v5e,v6e) with
    # headroom; shrink TB (then TK, keeping divisibility) if footprint overshoots.
    budget = int(_physical_vmem_bytes() * 0.85)

    def footprint(tb, tk_):
        return (2 * tb * tk_ * 2          # x tile   (bf16, double-buffered)
                + 2 * tk_ * Hp * 2        # W1 slice (bf16, double-buffered)
                + 1 * Hp * Op * 2         # W2       (bf16, single-buffered)
                + (Hp + Op) * 4           # biases   (f32, single-buffered)
                + 2 * tb * Op * 4         # out tile (f32, double-buffered)
                + tb * Hp * 4)            # f32 accumulator scratch

    while footprint(TB, TK) > budget:
        if TB > 16:
            TB = max(16, (TB // 2) // 16 * 16)
        elif TK % 256 == 0:               # TK/2 stays a multiple of 128 dividing INp
            TK //= 2
        else:
            break

    Bp = _round_up(B, TB)
    grid = (Bp // TB, INp // TK)

    # Only x is cast/padded per call.
    xp = jnp.zeros((Bp, INp), jnp.bfloat16).at[:B, :IN].set(x.astype(jnp.bfloat16))

    vmem_limit = min(max(int(footprint(TB, TK) * 1.3), 32 * 1024 * 1024), budget)

    n_batch_tiles = grid[0]
    cost = pl.CostEstimate(
        flops=2 * Bp * INp * Hp + 2 * Bp * Hp * Op,
        transcendentals=0,
        bytes_accessed=(xp.size * 2
                        + w1p.size * 2 * n_batch_tiles   # W1 re-streamed per batch tile
                        + w2p.size * 2 * n_batch_tiles
                        + (b1p.size + b2p.size) * 4
                        + Bp * Op * 4),
    )

    out = pl.pallas_call(
        mlp_kernel,
        out_shape=jax.ShapeDtypeStruct((Bp, Op), jnp.float32),
        grid_spec=pltpu.PrefetchScalarGridSpec(
            num_scalar_prefetch=0,
            grid=grid,
            in_specs=[
                pl.BlockSpec((TB, TK), lambda i, k: (i, k)),   # x tile
                pl.BlockSpec((TK, Hp), lambda i, k: (k, 0)),   # W1 K-slice
                _const_spec((1, Hp)),                          # b1 (resident, 1-buf)
                _const_spec((Hp, Op)),                         # W2 (resident, 1-buf)
                _const_spec((1, Op)),                          # b2 (resident, 1-buf)
            ],
            out_specs=pl.BlockSpec((TB, Op), lambda i, k: (i, 0)),
            scratch_shapes=[pltpu.VMEM((TB, Hp), jnp.float32)],
        ),
        compiler_params=pltpu.CompilerParams(
            dimension_semantics=("parallel", "arbitrary"),
            vmem_limit_bytes=vmem_limit,
        ),
        cost_estimate=cost,
    )(xp, w1p, b1p, w2p, b2p)

    return out[:B, :n_out]


def net_forward(x, w1, b1, w2, b2, *, batch_tile=512, k_tile=1024):
    """Convenience wrapper: prepare weights (once) + run the fused forward."""
    (w1p, b1p, w2p, b2p), meta = prepare_net_params(w1, b1, w2, b2, k_tile=k_tile)
    return net_forward_padded(x, w1p, b1p, w2p, b2p,
                              n_out=meta["n_out"], tk=meta["tk"],
                              batch_tile=batch_tile)


if __name__ == "__main__":
    # Small shapes consistent with the module's forward:
    #   input_features=384, hidden_sizes=256, output_features=96, batch=128
    # Tiles chosen so the demo exercises the batch grid (2 tiles -> both v7x TCs),
    # the K-reduction accumulator (IN padded 384 -> 512, 2 K steps) and output lane
    # padding (O padded 96 -> 128).
    B, IN, H, O = 128, 384, 256, 96

    key = jax.random.PRNGKey(0)
    kx, kw1, kb1, kw2, kb2 = jax.random.split(key, 5)

    x = jax.random.normal(kx, (B, IN), dtype=jnp.float32)
    w1 = jax.random.normal(kw1, (IN, H), dtype=jnp.float32) / jnp.sqrt(IN)
    b1 = jax.random.normal(kb1, (1, H), dtype=jnp.float32) * 0.01
    w2 = jax.random.normal(kw2, (H, O), dtype=jnp.float32) / jnp.sqrt(H)
    b2 = jax.random.normal(kb2, (1, O), dtype=jnp.float32) * 0.01

    # Weight prep happens once, outside the (jitted) per-call forward.
    (w1p, b1p, w2p, b2p), meta = prepare_net_params(w1, b1, w2, b2, k_tile=256)
    out = net_forward_padded(x, w1p, b1p, w2p, b2p,
                             n_out=meta["n_out"], tk=meta["tk"], batch_tile=64)
    jax.block_until_ready(out)

    # Pure-JAX f32 reference; tolerance loosened for bf16 MXU inputs.
    ref = jnp.maximum(x @ w1 + b1, 0.0) @ w2 + b2
    assert out.shape == (B, O)
    assert jnp.allclose(out, ref, atol=5e-2, rtol=5e-2), float(
        jnp.max(jnp.abs(out - ref)))

    print("KERNEL_OK")
</pallas_src>

<mosaic_0001>
module attributes {stable_mosaic.version = 11 : i64} {
  func.func @mlp_kernel(%arg0: i32, %arg1: i32, %arg2: memref<64x256xbf16, #tpu.memory_space<vmem>>, %arg3: memref<256x256xbf16, #tpu.memory_space<vmem>>, %arg4: memref<1x256xf32, #tpu.memory_space<vmem>>, %arg5: memref<256x128xbf16, #tpu.memory_space<vmem>>, %arg6: memref<1x128xf32, #tpu.memory_space<vmem>>, %arg7: memref<64x128xf32, #tpu.memory_space<vmem>>, %arg8: memref<64x256xf32, #tpu.memory_space<vmem>>) attributes {dimension_semantics = [#tpu.dimension_semantics<parallel>, #tpu.dimension_semantics<arbitrary>], iteration_bounds = array<i64: 2, 2>, scalar_prefetch = 0 : i64, scratch_operands = 1 : i64, tpu.core_type = #tpu.core_type<tc>, window_params = [{transform_indices = @transform_0, window_bounds = array<i64: 64, 256>}, {transform_indices = @transform_1, window_bounds = array<i64: 256, 256>}, {pipeline_mode = #tpu.pipeline_mode<synchronous>, transform_indices = @transform_2, window_bounds = array<i64: 1, 256>}, {pipeline_mode = #tpu.pipeline_mode<synchronous>, transform_indices = @transform_3, window_bounds = array<i64: 256, 128>}, {pipeline_mode = #tpu.pipeline_mode<synchronous>, transform_indices = @transform_4, window_bounds = array<i64: 1, 128>}, {transform_indices = @transform_5, window_bounds = array<i64: 64, 128>}]} {
    %c0 = arith.constant 0 : index
    %c0_0 = arith.constant 0 : index
    %0 = vector.load %arg2[%c0, %c0_0] : memref<64x256xbf16, #tpu.memory_space<vmem>>, vector<64x256xbf16>
    %c0_1 = arith.constant 0 : index
    %c0_2 = arith.constant 0 : index
    %1 = vector.load %arg3[%c0_1, %c0_2] : memref<256x256xbf16, #tpu.memory_space<vmem>>, vector<256x256xbf16>
    %cst = arith.constant dense<0.000000e+00> : vector<64x256xf32>
    %2 = tpu.matmul %0, %1, %cst {dimension_numbers = #tpu.dot_dimension_numbers<[1], [0], [0], [1], [0, 0, 1, 1], [], []>} : vector<64x256xbf16>, vector<256x256xbf16>, vector<64x256xf32> -> vector<64x256xf32>
    %c0_i32 = arith.constant 0 : i32
    %3 = arith.cmpi eq, %arg1, %c0_i32 : i32
    %4 = arith.extui %3 : i1 to i32
    %c0_i32_3 = arith.constant 0 : i32
    %5 = arith.cmpi ne, %4, %c0_i32_3 : i32
    scf.if %5 {
      %c0_7 = arith.constant 0 : index
      %c0_8 = arith.constant 0 : index
      %12 = vector.load %arg8[%c0_7, %c0_8] : memref<64x256xf32, #tpu.memory_space<vmem>>, vector<64x256xf32>
      tpu.vector_store %arg8[%c0_7, %c0_8], %2 {strides = array<i32>} : memref<64x256xf32, #tpu.memory_space<vmem>>, vector<64x256xf32>,
    } else {
    }
    %c0_i32_4 = arith.constant 0 : i32
    %6 = arith.cmpi ne, %arg1, %c0_i32_4 : i32
    %7 = arith.extui %6 : i1 to i32
    %c0_i32_5 = arith.constant 0 : i32
    %8 = arith.cmpi ne, %7, %c0_i32_5 : i32
    scf.if %8 {
      %c0_7 = arith.constant 0 : index
      %c0_8 = arith.constant 0 : index
      %12 = vector.load %arg8[%c0_7, %c0_8] : memref<64x256xf32, #tpu.memory_space<vmem>>, vector<64x256xf32>
      %13 = arith.addf %12, %2 : vector<64x256xf32>
      %c0_9 = arith.constant 0 : index
      %c0_10 = arith.constant 0 : index
      %14 = vector.load %arg8[%c0_9, %c0_10] : memref<64x256xf32, #tpu.memory_space<vmem>>, vector<64x256xf32>
      tpu.vector_store %arg8[%c0_9, %c0_10], %13 {strides = array<i32>} : memref<64x256xf32, #tpu.memory_space<vmem>>, vector<64x256xf32>,
    } else {
    }
    %c1_i32 = arith.constant 1 : i32
    %9 = arith.cmpi eq, %arg1, %c1_i32 : i32
    %10 = arith.extui %9 : i1 to i32
    %c0_i32_6 = arith.constant 0 : i32
    %11 = arith.cmpi ne, %10, %c0_i32_6 : i32
    scf.if %11 {
      %c0_7 = arith.constant 0 : index
      %c0_8 = arith.constant 0 : index
      %12 = vector.load %arg8[%c0_7, %c0_8] : memref<64x256xf32, #tpu.memory_space<vmem>>, vector<64x256xf32>
      %c0_9 = arith.constant 0 : index
      %c0_10 = arith.constant 0 : index
      %13 = vector.load %arg4[%c0_9, %c0_10] : memref<1x256xf32, #tpu.memory_space<vmem>>, vector<1x256xf32>
      %14 = vector.broadcast %13 : vector<1x256xf32> to vector<64x256xf32>
      %15 = arith.addf %12, %14 : vector<64x256xf32>
      %cst_11 = arith.constant 0.000000e+00 : f32
      %16 = vector.broadcast %cst_11 : f32 to vector<64x256xf32>
      %17 = arith.maximumf %15, %16 : vector<64x256xf32>
      %18 = arith.truncf %17 : vector<64x256xf32> to vector<64x256xbf16>
      %c0_12 = arith.constant 0 : index
      %c0_13 = arith.constant 0 : index
      %19 = vector.load %arg5[%c0_12, %c0_13] : memref<256x128xbf16, #tpu.memory_space<vmem>>, vector<256x128xbf16>
      %cst_14 = arith.constant dense<0.000000e+00> : vector<64x128xf32>
      %20 = tpu.matmul %18, %19, %cst_14 {dimension_numbers = #tpu.dot_dimension_numbers<[1], [0], [0], [1], [0, 0, 1, 1], [], []>} : vector<64x256xbf16>, vector<256x128xbf16>, vector<64x128xf32> -> vector<64x128xf32>
      %c0_15 = arith.constant 0 : index
      %c0_16 = arith.constant 0 : index
      %21 = vector.load %arg6[%c0_15, %c0_16] : memref<1x128xf32, #tpu.memory_space<vmem>>, vector<1x128xf32>
      %22 = vector.broadcast %21 : vector<1x128xf32> to vector<64x128xf32>
      %23 = arith.addf %20, %22 : vector<64x128xf32>
      %c0_17 = arith.constant 0 : index
      %c0_18 = arith.constant 0 : index
      %24 = vector.load %arg7[%c0_17, %c0_18] : memref<64x128xf32, #tpu.memory_space<vmem>>, vector<64x128xf32>
      tpu.vector_store %arg7[%c0_17, %c0_18], %23 {strides = array<i32>} : memref<64x128xf32, #tpu.memory_space<vmem>>, vector<64x128xf32>,
    } else {
    }
    return
  }
  func.func @transform_0(%arg0: i32, %arg1: i32) -> (i32, i32) {
    %c0_i32 = arith.constant 0 : i32
    return %arg0, %arg1 : i32, i32
  }
  func.func @transform_1(%arg0: i32, %arg1: i32) -> (i32, i32) {
    %c0_i32 = arith.constant 0 : i32
    %c0_i32_0 = arith.constant 0 : i32
    return %arg1, %c0_i32 : i32, i32
  }
  func.func @transform_2(%arg0: i32, %arg1: i32) -> (i32, i32) {
    %c0_i32 = arith.constant 0 : i32
    %c0_i32_0 = arith.constant 0 : i32
    %c0_i32_1 = arith.constant 0 : i32
    return %c0_i32, %c0_i32_0 : i32, i32
  }
  func.func @transform_3(%arg0: i32, %arg1: i32) -> (i32, i32) {
    %c0_i32 = arith.constant 0 : i32
    %c0_i32_0 = arith.constant 0 : i32
    %c0_i32_1 = arith.constant 0 : i32
    return %c0_i32, %c0_i32_0 : i32, i32
  }
  func.func @transform_4(%arg0: i32, %arg1: i32) -> (i32, i32) {
    %c0_i32 = arith.constant 0 : i32
    %c0_i32_0 = arith.constant 0 : i32
    %c0_i32_1 = arith.constant 0 : i32
    return %c0_i32, %c0_i32_0 : i32, i32
  }
  func.func @transform_5(%arg0: i32, %arg1: i32) -> (i32, i32) {
    %c0_i32 = arith.constant 0 : i32
    %c0_i32_0 = arith.constant 0 : i32
    return %arg0, %c0_i32 : i32, i32
  }
}

</mosaic_0001>

<bundles_post_ra>
// kernel: net_forward_padded.1
= control target key start
LH: loop header
LB: loop body
LE: loop exit
PB: predicated region body
PF: predicated region fallthrough
CT: control target
= control target key end

     0   :  { %s1577_s18 = smov 0   ;;  %s1579_s19 = smov 0   ;;  %s1907_s0 = inlined_call_operand.vmem [shape: bf16[128,512], index: 0, kind: input, shape index: {}]   ;;  %s1908_s1 = inlined_call_operand.vmem [shape: bf16[512,256], index: 1, kind: input, shape index: {}]   ;;  %s1909_s2 = inlined_call_operand.vmem [shape: f32[1,256], index: 2, kind: input, shape index: {}]   ;;  %s1910_s3 = inlined_call_operand.vmem [shape: bf16[256,128], index: 3, kind: input, shape index: {}]   ;;  %s1911_s4 = inlined_call_operand.vmem [shape: f32[1,128], index: 4, kind: input, shape index: {}]   ;;  %s1912_s5 = inlined_call_operand.vmem [shape: f32[128,128], index: 5, kind: output, shape index: {}]  }
   0x1   :  { %s1581_s20 = smov 0   ;;  %s1583_s21 = smov 0  }
   0x2   :  { %s1585_s22 = smov 0   ;;  %s1587_s23 = smov 0  }
   0x3   :  { %s1589_s24 = smov 0  }
   0x4 LB: > { %s24_s25 = sadd.s32 1, %s1537_s22  ;;  %s27_s26 = sadd.s32 1, %s1541_s23  ;;  %s1545_s24 = sphi %s1589_s24, %s15_s24   ;;  %s1541_s23 = sphi %s1587_s23, %s1918_s23   ;;  %s1537_s22 = sphi %s1585_s22, %s1917_s22   ;;  %s1533_s21 = sphi %s1583_s21, %s1916_s21   ;;  %s1529_s20 = sphi %s1581_s20, %s1915_s20   ;;  %s1525_s19 = sphi %s1579_s19, %s1914_s19   ;;  %s1521_s18 = sphi %s1577_s18, %s1913_s18  }
   0x5   : > { %p25_p0 = scmp.ge.s32.totalorder %s24_s25, 2  ;;  %p43_p1 = scmp.ne.s32.totalorder %s1525_s19, %s1521_s18 }
   0x6   : > { %p44_p2 = scmp.eq.s32.totalorder %s1545_s24, 0  ;;  %s36_s30 = sadd.s32 1, %s1525_s19 }
   0x7   : > { %s1920_s25 = smov (%p25_p0, %s24_s25), 0  ;;  %s1922_s26 = smov (!%p25_p0, %s27_s26), %s1541_s23 }
   0x8   : > { %p45_p3 = por %p44_p2, %p43_p1  ;;  %p29_p4 = scmp.ge.s32.totalorder %s1922_s26, 2 }
   0x9   : > { %s32_s27 = ssub.s32 %s1537_s22, %s1920_s25  ;;  %p1118_p6 = scmp.ge.s32.totalorder %s1545_s24, 4 }
   0xa   : > { %s1924_s26 = smov (%p29_p4, %s1922_s26), 0 }
   0xb   : > { %s31_s28 = ssub.s32 %s1541_s23, %s1924_s26  ;;  %193 = sbr.rel (%p1118_p6) target bundleno = 31 (0x1f), region = 28 }
   0xc   : > { %s33_s29 = sor.u32 %s32_s27, %s31_s28 }
   0xd   : > { %p34_p5 = scmp.eq.s32.totalorder %s33_s29, 0 }
   0xf   : > { %s1628_s6 = scalar_select %p34_p5, %s1525_s19, %s36_s30  }
  0x10   : > { %196 = sbr.rel (!%p45_p3) target bundleno = 31 (0x1f), region = 32  ;;  %s198_s7 = sand.u32 (%p45_p3), 1, %s1525_s19  }
  0x11   : > { %s1121_s8 = sshll.u32 (%p45_p3), %s1537_s22, 1  ;;  %s1119_s9 = sshll.u32 (%p45_p3), %s198_s7, 6 }
  0x12   : > { %s1360_s10 = sshll.u32 (%p45_p3), %s1541_s23, 5  ;;  %s200_s16 = scalar_lea.vmem (%p45_p3), [#allocation3], %s1119_s9 }
  0x13   : > { %s204_s11 = sadd.s32 (%p45_p3), %s1360_s10, %s1121_s8 }
  0x14   : > { %s1123_s12 = sshll.u32 (%p45_p3), %s204_s11, 2 }
  0x15   : > { %s206_s15 = scalar_lea.vmem %s1907_s0, %s1123_s12 }
  0x16   : > { %v249_v0 = vld [vmem:[%s206_s15] sm:$0xff]  ;;  %v251_v1 = vld [vmem:[%s206_s15 + $0x10] sm:$0xff] }
  0x17   : > { %v253_v2 = vld [vmem:[%s206_s15 + $0x20] sm:$0xff]  ;;  %250 = vst [vmem:[%s200_s16] sm:$0xff] %v249_v0  ;;  %v255_v3 = vld [vmem:[%s206_s15 + $0x30] sm:$0xff] }
  0x18   : > { %252 = vst [vmem:[%s200_s16 + $0x8] sm:$0xff] %v251_v1  ;;  %v257_v4 = vld [vmem:[%s206_s15 + $0x40] sm:$0xff]  ;;  %v259_v5 = vld [vmem:[%s206_s15 + $0x50] sm:$0xff] }
  0x19   : > { %254 = vst [vmem:[%s200_s16 + $0x10] sm:$0xff] %v253_v2  ;;  %v261_v6 = vld [vmem:[%s206_s15 + $0x60] sm:$0xff]  ;;  %v263_v7 = vld [vmem:[%s206_s15 + $0x70] sm:$0xff] }
  0x1a   : > { %256 = vst [vmem:[%s200_s16 + $0x18] sm:$0xff] %v255_v3 }
  0x1b   : > { %258 = vst [vmem:[%s200_s16 + $0x20] sm:$0xff] %v257_v4 }
  0x1c   : > { %260 = vst [vmem:[%s200_s16 + $0x28] sm:$0xff] %v259_v5 }
  0x1d   : > { %262 = vst [vmem:[%s200_s16 + $0x30] sm:$0xff] %v261_v6 }
  0x1e   : > { %264 = vst [vmem:[%s200_s16 + $0x38] sm:$0xff] %v263_v7 }
  0x1f PF: > { %p1124_p7 = scmp.ge.s32.totalorder %s1545_s24, 1  ;;  %p279_p8 = scmp.lt.s32.totalorder %s1545_s24, 5 }
  0x21   : > { %p280_p9 = pnand %p1124_p7, %p279_p8 }
  0x22   : > { %s1126_s17 = sshll.u32 (!%p280_p9), %s1529_s20, 5  ;;  %s1129_s27 = sshll.u32 (!%p280_p9), %s1533_s21, 3 }
  0x23   : > { %283 = sbr.rel (%p280_p9) target bundleno = 510 (0x1fe), region = 74  ;;  %p322_p10 = scmp.lt.s32.totalorder (!%p280_p9), %s1126_s17, 63 }
  0x24   : > { %p329_p11 = scmp.lt.s32.totalorder (!%p280_p9), %s1129_s27, 15  ;;  %s286_s11 = sand.u32 (!%p280_p9), 1, %s1521_s18  }
  0x25   : > { %s1700_s18 = sshll.u32 (!%p280_p9), %s286_s11, 6  ;;  %p1291_p12 = scmp.ne.s32.totalorder (!%p280_p9), %s1529_s20, 0 }
  0x26   : > { %s1719_s12 = scalar_lea.vmem (!%p280_p9), [#allocation3], %s1700_s18 }
  0x28   : > { %s1926_s17 = smov (!%p322_p10, %s1126_s17), 63  ;;  %s1928_s27 = smov (!%p329_p11, %s1129_s27), 15 }
  0x29   : > { %s1361_s28 = sshll.u32 %s1926_s17, 3  ;;  %s1130_s21 = sshll.u32 %s1928_s27, 3 }
  0x2a   : > { %s1644_s7 = scalar_lea.vmem %s1908_s1, %s1361_s28  ;;  %s1649_s10 = scalar_lea.vmem %s1912_s5, %s1130_s21 }
  0x2b   : > { %v1221_v8 = vld [vmem:[%s1644_s7 + $0x70] sm:$0xf]  ;;  %v1385_v9 = vld [vmem:[%s1644_s7 + $0x74] sm:$0xf0]  ;;  %v1384_v13 = vld [vmem:[%s1644_s7 + $0x74] sm:$0xf] }
  0x2c   : > { %v1285_v10 = vld [vmem:[%s1644_s7 + $0xf0] sm:$0xf]  ;;  %v1222_v11 = vor.u32 %v1385_v9, %v1221_v8  ;;  %v1401_v12 = vld [vmem:[%s1644_s7 + $0xf4] sm:$0xf0]  ;;  %v1223_v14 = vld [vmem:[%s1644_s7 + $0x78] sm:$0xf0] }
  0x2d   : > { %v1286_v15 = vor.u32 %v1401_v12, %v1285_v10  ;;  %v1226_v16 = vor.u32 %v1384_v13, %v1223_v14  ;;  %v1400_v17 = vld [vmem:[%s1644_s7 + $0xf4] sm:$0xf]  ;;  %v1287_v18 = vld [vmem:[%s1644_s7 + $0xf8] sm:$0xf0]  ;;  %v1213_v19 = vld [vmem:[%s1644_s7 + $0x60] sm:$0xf] }
  0x2e   : > { %574 = vmatpush.bf16.msra.mxu0 %v1222_v11  ;;  %v1290_v20 = vor.u32 %v1400_v17, %v1287_v18  ;;  %v1383_v21 = vld [vmem:[%s1644_s7 + $0x64] sm:$0xf0]  ;;  %v1277_v22 = vld [vmem:[%s1644_s7 + $0xe0] sm:$0xf]  ;;  %v1382_v26 = vld [vmem:[%s1644_s7 + $0x64] sm:$0xf] }
  0x2f   : > { %v1399_v23 = vld [vmem:[%s1644_s7 + $0xe4] sm:$0xf0]  ;;  %603 = vmatpush.bf16.msra.mxu1 %v1286_v15  ;;  %632 = vmatpush.bf16.msra.mxu2 %v1226_v16  ;;  %v1214_v24 = vor.u32 %v1383_v21, %v1213_v19  ;;  %v1215_v27 = vld [vmem:[%s1644_s7 + $0x68] sm:$0xf0]  ;;  %v1398_v28 = vld [vmem:[%s1644_s7 + $0xe4] sm:$0xf] }
  0x30   : > { %v1278_v25 = vor.u32 %v1399_v23, %v1277_v22  ;;  %661 = vmatpush.bf16.msra.mxu3 %v1290_v20  ;;  %v1218_v29 = vor.u32 %v1382_v26, %v1215_v27  ;;  %v1279_v30 = vld [vmem:[%s1644_s7 + $0xe8] sm:$0xf0]  ;;  %v1205_v31 = vld [vmem:[%s1644_s7 + $0x50] sm:$0xf]  ;;  %v1381_v32 = vld [vmem:[%s1644_s7 + $0x54] sm:$0xf0] }
  0x31   : > { %v1282_v33 = vor.u32 %v1398_v28, %v1279_v30  ;;  %v1269_v34 = vld [vmem:[%s1644_s7 + $0xd0] sm:$0xf]  ;;  %v1397_v35 = vld [vmem:[%s1644_s7 + $0xd4] sm:$0xf0]  ;;  %v1380_v36 = vld [vmem:[%s1644_s7 + $0x54] sm:$0xf]  ;;  %v1206_v37 = vor.u32 %v1381_v32, %v1205_v31 }
  0x32   : > { %575 = vmatpush.bf16.msra.mxu0 %v1214_v24  ;;  %v1207_v38 = vld [vmem:[%s1644_s7 + $0x58] sm:$0xf0]  ;;  %v1396_v39 = vld [vmem:[%s1644_s7 + $0xd4] sm:$0xf]  ;;  %v1270_v41 = vor.u32 %v1397_v35, %v1269_v34  ;;  %v1197_v43 = vld [vmem:[%s1644_s7 + $0x40] sm:$0xf] }
  0x33   : > { %v1271_v40 = vld [vmem:[%s1644_s7 + $0xd8] sm:$0xf0]  ;;  %604 = vmatpush.bf16.msra.mxu1 %v1278_v25  ;;  %633 = vmatpush.bf16.msra.mxu2 %v1218_v29  ;;  %v1210_v42 = vor.u32 %v1380_v36, %v1207_v38  ;;  %v1379_v44 = vld [vmem:[%s1644_s7 + $0x44] sm:$0xf0]  ;;  %v1261_v45 = vld [vmem:[%s1644_s7 + $0xc0] sm:$0xf] }
  0x34   : > { %662 = vmatpush.bf16.msra.mxu3 %v1282_v33  ;;  %v1274_v46 = vor.u32 %v1396_v39, %v1271_v40  ;;  %v1395_v47 = vld [vmem:[%s1644_s7 + $0xc4] sm:$0xf0]  ;;  %v1378_v48 = vld [vmem:[%s1644_s7 + $0x44] sm:$0xf]  ;;  %v1199_v49 = vld [vmem:[%s1644_s7 + $0x48] sm:$0xf0]  ;;  %v1198_v52 = vor.u32 %v1379_v44, %v1197_v43 }
  0x35   : > { %v1394_v50 = vld [vmem:[%s1644_s7 + $0xc4] sm:$0xf]  ;;  %v1263_v51 = vld [vmem:[%s1644_s7 + $0xc8] sm:$0xf0]  ;;  %v1262_v53 = vor.u32 %v1395_v47, %v1261_v45  ;;  %v1202_v54 = vor.u32 %v1378_v48, %v1199_v49  ;;  %v1189_v55 = vld [vmem:[%s1644_s7 + $0x30] sm:$0xf] }
  0x36   : > { %576 = vmatpush.bf16.msra.mxu0 %v1206_v37  ;;  %v1377_v56 = vld [vmem:[%s1644_s7 + $0x34] sm:$0xf0]  ;;  %v1253_v57 = vld [vmem:[%s1644_s7 + $0xb0] sm:$0xf]  ;;  %v1266_v58 = vor.u32 %v1394_v50, %v1263_v51  ;;  %v1376_v60 = vld [vmem:[%s1644_s7 + $0x34] sm:$0xf] }
  0x37   : > { %605 = vmatpush.bf16.msra.mxu1 %v1270_v41  ;;  %634 = vmatpush.bf16.msra.mxu2 %v1210_v42  ;;  %v1393_v59 = vld [vmem:[%s1644_s7 + $0xb4] sm:$0xf0]  ;;  %v1191_v61 = vld [vmem:[%s1644_s7 + $0x38] sm:$0xf0]  ;;  %v1392_v62 = vld [vmem:[%s1644_s7 + $0xb4] sm:$0xf]  ;;  %v1190_v0 = vor.u32 %v1377_v56, %v1189_v55 }
  0x38   : > { %663 = vmatpush.bf16.msra.mxu3 %v1274_v46  ;;  %v1255_v63 = vld [vmem:[%s1644_s7 + $0xb8] sm:$0xf0]  ;;  %v1254_v1 = vor.u32 %v1393_v59, %v1253_v57  ;;  %v1194_v2 = vor.u32 %v1376_v60, %v1191_v61  ;;  %v1181_v3 = vld [vmem:[%s1644_s7 + $0x20] sm:$0xf]  ;;  %v1375_v4 = vld [vmem:[%s1644_s7 + $0x24] sm:$0xf0] }
  0x39   : > { %v1245_v5 = vld [vmem:[%s1644_s7 + $0xa0] sm:$0xf]  ;;  %v1258_v6 = vor.u32 %v1392_v62, %v1255_v63  ;;  %v1391_v7 = vld [vmem:[%s1644_s7 + $0xa4] sm:$0xf0]  ;;  %v1374_v8 = vld [vmem:[%s1644_s7 + $0x24] sm:$0xf]  ;;  %v1182_v12 = vor.u32 %v1375_v4, %v1181_v3 }
  0x3a   : > { %577 = vmatpush.bf16.msra.mxu0 %v1198_v52  ;;  %v1183_v9 = vld [vmem:[%s1644_s7 + $0x28] sm:$0xf0]  ;;  %v1390_v10 = vld [vmem:[%s1644_s7 + $0xa4] sm:$0xf]  ;;  %v1246_v13 = vor.u32 %v1391_v7, %v1245_v5  ;;  %v1173_v15 = vld [vmem:[%s1644_s7 + $0x10] sm:$0xf] }
  0x3b   : > { %606 = vmatpush.bf16.msra.mxu1 %v1262_v53  ;;  %635 = vmatpush.bf16.msra.mxu2 %v1202_v54  ;;  %v1247_v11 = vld [vmem:[%s1644_s7 + $0xa8] sm:$0xf0]  ;;  %v1186_v14 = vor.u32 %v1374_v8, %v1183_v9  ;;  %v1373_v16 = vld [vmem:[%s1644_s7 + $0x14] sm:$0xf0]  ;;  %v1237_v17 = vld [vmem:[%s1644_s7 + $0x90] sm:$0xf] }
  0x3c   : > { %664 = vmatpush.bf16.msra.mxu3 %v1266_v58  ;;  %v1250_v18 = vor.u32 %v1390_v10, %v1247_v11  ;;  %v1389_v19 = vld [vmem:[%s1644_s7 + $0x94] sm:$0xf0]  ;;  %v1372_v20 = vld [vmem:[%s1644_s7 + $0x14] sm:$0xf]  ;;  %v1175_v21 = vld [vmem:[%s1644_s7 + $0x18] sm:$0xf0]  ;;  %v1174_v24 = vor.u32 %v1373_v16, %v1173_v15 }
  0x3d   : > { %v1388_v22 = vld [vmem:[%s1644_s7 + $0x94] sm:$0xf]  ;;  %v1239_v23 = vld [vmem:[%s1644_s7 + $0x98] sm:$0xf0]  ;;  %v1165_v25 = vld [vmem:[%s1644_s7] sm:$0xf]  ;;  %v1238_v26 = vor.u32 %v1389_v19, %v1237_v17  ;;  %v1178_v27 = vor.u32 %v1372_v20, %v1175_v21 }
  0x3e   : > { %578 = vmatpush.bf16.msra.mxu0 %v1190_v0  ;;  %v1371_v28 = vld [vmem:[%s1644_s7 + $0x4] sm:$0xf0]  ;;  %v1229_v29 = vld [vmem:[%s1644_s7 + $0x80] sm:$0xf]  ;;  %v1242_v30 = vor.u32 %v1388_v22, %v1239_v23  ;;  %v1370_v32 = vld [vmem:[%s1644_s7 + $0x4] sm:$0xf] }
  0x3f   : > { %607 = vmatpush.bf16.msra.mxu1 %v1254_v1  ;;  %636 = vmatpush.bf16.msra.mxu2 %v1194_v2  ;;  %v1387_v31 = vld [vmem:[%s1644_s7 + $0x84] sm:$0xf0]  ;;  %v1167_v33 = vld [vmem:[%s1644_s7 + $0x8] sm:$0xf0]  ;;  %v1386_v34 = vld [vmem:[%s1644_s7 + $0x84] sm:$0xf]  ;;  %v1166_v36 = vor.u32 %v1371_v28, %v1165_v25 }
  0x40   : > { %665 = vmatpush.bf16.msra.mxu3 %v1258_v6  ;;  %v1231_v35 = vld [vmem:[%s1644_s7 + $0x88] sm:$0xf0]  ;;  %v1133_v37 = vld [vmem:[%s1719_s12] sm:$0xf]  ;;  %v1363_v38 = vld [vmem:[%s1719_s12 + $0x4] sm:$0xf0]  ;;  %v1230_v39 = vor.u32 %v1387_v31, %v1229_v29  ;;  %v1170_v40 = vor.u32 %v1370_v32, %v1167_v33 }
  0x41   : > { %v1362_v41 = vld [vmem:[%s1719_s12 + $0x4] sm:$0xf]  ;;  %v1135_v42 = vld [vmem:[%s1719_s12 + $0x8] sm:$0xf0]  ;;  %v1234_v43 = vor.u32 %v1386_v34, %v1231_v35  ;;  %v1134_v44 = vor.u32 %v1363_v38, %v1133_v37  ;;  %v1141_v46 = vld [vmem:[%s1719_s12 + $0x10] sm:$0xf] }
  0x42   : > { %579 = vmatpush.bf16.msra.mxu0 %v1182_v12  ;;  %v1138_v45 = vor.u32 %v1362_v41, %v1135_v42  ;;  %v1365_v47 = vld [vmem:[%s1719_s12 + $0x14] sm:$0xf0]  ;;  %v1364_v48 = vld [vmem:[%s1719_s12 + $0x14] sm:$0xf]  ;;  %v1143_v49 = vld [vmem:[%s1719_s12 + $0x18] sm:$0xf0] }
  0x43   : > { %608 = vmatpush.bf16.msra.mxu1 %v1246_v13  ;;  %637 = vmatpush.bf16.msra.mxu2 %v1186_v14  ;;  %v1142_v50 = vor.u32 %v1365_v47, %v1141_v46  ;;  %v1146_v51 = vor.u32 %v1364_v48, %v1143_v49  ;;  %v1149_v52 = vld [vmem:[%s1719_s12 + $0x20] sm:$0xf]  ;;  %v1367_v53 = vld [vmem:[%s1719_s12 + $0x24] sm:$0xf0]  ;;  %v1366_v54 = vld [vmem:[%s1719_s12 + $0x24] sm:$0xf] }
  0x44   : > { %666 = vmatpush.bf16.msra.mxu3 %v1250_v18  ;;  %v1151_v55 = vld [vmem:[%s1719_s12 + $0x28] sm:$0xf0]  ;;  %v1150_v56 = vor.u32 %v1367_v53, %v1149_v52  ;;  %v1157_v58 = vld [vmem:[%s1719_s12 + $0x30] sm:$0xf]  ;;  %v1369_v59 = vld [vmem:[%s1719_s12 + $0x34] sm:$0xf0] }
  0x45   : > { %v1154_v57 = vor.u32 %v1366_v54, %v1151_v55  ;;  %v1368_v60 = vld [vmem:[%s1719_s12 + $0x34] sm:$0xf]  ;;  %v1159_v61 = vld [vmem:[%s1719_s12 + $0x38] sm:$0xf0]  ;;  %v1158_v62 = vor.u32 %v1369_v59, %v1157_v58 }
  0x46   : > { %580 = vmatpush.bf16.msra.mxu0 %v1174_v24  ;;  %v1162_v63 = vor.u32 %v1368_v60, %v1159_v61 }
  0x47   : > { %609 = vmatpush.bf16.msra.mxu1 %v1238_v26  ;;  %638 = vmatpush.bf16.msra.mxu2 %v1178_v27 }
  0x48   : > { %667 = vmatpush.bf16.msra.mxu3 %v1242_v30 }
  0x4a   : > { %581 = vmatpush.bf16.msra.mxu0 %v1166_v36 }
  0x4b   : > { %610 = vmatpush.bf16.msra.mxu1 %v1230_v39  ;;  %639 = vmatpush.bf16.msra.mxu2 %v1170_v40 }
  0x4c   : > { %668 = vmatpush.bf16.msra.mxu3 %v1234_v43 }
  0x4d   : > { %582 = vmatmul.bf16.vlgmr.msra.gmra.mxu0 %v1134_v44 }
  0x4e   : > { %611 = vmatmul.bf16.vlgmr.msra.gmra.mxu1 %v1138_v45  ;;  %640 = vmatmul.bf16.vlgmr.msra.gmra.mxu2 %v1134_v44 }
  0x4f   : > { %669 = vmatmul.bf16.vlgmr.msra.gmra.mxu3 %v1138_v45 }
  0x5d   : > { %587 = vmatmul.bf16.gmra.mxu0 %v1142_v50 }
  0x5e   : > { %616 = vmatmul.bf16.gmra.mxu1 %v1146_v51  ;;  %645 = vmatmul.bf16.gmra.mxu2 %v1142_v50 }
  0x5f   : > { %674 = vmatmul.bf16.gmra.mxu3 %v1146_v51 }
  0x6d   : > { %592 = vmatmul.bf16.gmra.mxu0 %v1150_v56 }
  0x6e   : > { %621 = vmatmul.bf16.gmra.mxu1 %v1154_v57  ;;  %650 = vmatmul.bf16.gmra.mxu2 %v1150_v56 }
  0x6f   : > { %679 = vmatmul.bf16.gmra.mxu3 %v1154_v57 }
  0x7d   : > { %597 = vmatmul.bf16.gmra.mxu0 %v1158_v62 }
  0x7e   : > { %626 = vmatmul.bf16.gmra.mxu1 %v1162_v63  ;;  %655 = vmatmul.bf16.gmra.mxu2 %v1158_v62 }
  0x7f   : > { %684 = vmatmul.bf16.gmra.mxu3 %v1162_v63 }
  0xca   : > { %v583_v0 = vpop.f32.mrf.mxu0 }
  0xcb   : > { %v612_v1 = vpop.f32.mrf.mxu1 }
  0xcc   : > { %v1737_v2 = vadd.f32 %v612_v1, %v583_v0 }
  0xd1   : > { %v641_v3 = vpop.f32.mrf.mxu2 }
  0xd2   : > { %v670_v4 = vpop.f32.mrf.mxu3  ;;  %v585_v5 = vpop.f32.mrf.mxu0 }
  0xd3   : > { %v1739_v6 = vadd.f32 %v670_v4, %v641_v3  ;;  %v614_v7 = vpop.f32.mrf.mxu1 }
  0xd4   : > { %v1741_v8 = vadd.f32 %v614_v7, %v585_v5 }
  0xd9   : > { %v643_v9 = vpop.f32.mrf.mxu2 }
  0xda   : > { %v672_v10 = vpop.f32.mrf.mxu3  ;;  %v588_v11 = vpop.f32.mrf.mxu0 }
  0xdb   : > { %v1743_v12 = vadd.f32 %v672_v10, %v643_v9  ;;  %v617_v13 = vpop.f32.mrf.mxu1 }
  0xdc   : > { %v1745_v14 = vadd.f32 %v617_v13, %v588_v11 }
  0xe1   : > { %v646_v15 = vpop.f32.mrf.mxu2 }
  0xe2   : > { %v675_v16 = vpop.f32.mrf.mxu3  ;;  %v590_v17 = vpop.f32.mrf.mxu0 }
  0xe3   : > { %v1747_v18 = vadd.f32 %v675_v16, %v646_v15  ;;  %v619_v19 = vpop.f32.mrf.mxu1 }
  0xe4   : > { %v1749_v20 = vadd.f32 %v619_v19, %v590_v17 }
  0xe9   : > { %v648_v21 = vpop.f32.mrf.mxu2 }
  0xea   : > { %v677_v22 = vpop.f32.mrf.mxu3  ;;  %v593_v23 = vpop.f32.mrf.mxu0 }
  0xeb   : > { %v1751_v24 = vadd.f32 %v677_v22, %v648_v21  ;;  %v622_v25 = vpop.f32.mrf.mxu1 }
  0xec   : > { %v1753_v26 = vadd.f32 %v622_v25, %v593_v23 }
  0xf1   : > { %v651_v27 = vpop.f32.mrf.mxu2 }
  0xf2   : > { %v680_v28 = vpop.f32.mrf.mxu3  ;;  %v595_v29 = vpop.f32.mrf.mxu0 }
  0xf3   : > { %v1755_v30 = vadd.f32 %v680_v28, %v651_v27  ;;  %v624_v31 = vpop.f32.mrf.mxu1 }
  0xf4   : > { %v1757_v32 = vadd.f32 %v624_v31, %v595_v29 }
  0xf9   : > { %v653_v33 = vpop.f32.mrf.mxu2 }
  0xfa   : > { %v682_v34 = vpop.f32.mrf.mxu3  ;;  %v598_v35 = vpop.f32.mrf.mxu0 }
  0xfb   : > { %v1759_v36 = vadd.f32 %v682_v34, %v653_v33  ;;  %v627_v37 = vpop.f32.mrf.mxu1 }
  0xfc   : > { %v1761_v38 = vadd.f32 %v627_v37, %v598_v35 }
 0x101   : > { %v656_v39 = vpop.f32.mrf.mxu2 }
 0x102   : > { %v685_v40 = vpop.f32.mrf.mxu3  ;;  %v600_v41 = vpop.f32.mrf.mxu0 }
 0x103   : > { %v1763_v42 = vadd.f32 %v685_v40, %v656_v39  ;;  %v629_v43 = vpop.f32.mrf.mxu1 }
 0x104   : > { %v1765_v44 = vadd.f32 %v629_v43, %v600_v41 }
 0x107   : > { %693 = sbr.rel (%p1291_p12) target bundleno = 284 (0x11c), region = 82 }
 0x109   : > { %v658_v45 = vpop.f32.mrf.mxu2 }
 0x10a   : > { %v687_v46 = vpop.f32.mrf.mxu3 }
 0x10b   : > { %v1767_v47 = vadd.f32 %v687_v46, %v658_v45 }
 0x10c   : > { %694 = vst [vmem:[#allocation2 + $0x30] sm:$0xff] %v1737_v2 }
 0x10d   : > { %695 = vst [vmem:[#allocation2] sm:$0xff] %v1739_v6 }
 0x10e   : > { %696 = vst [vmem:[#allocation2 + $0x58] sm:$0xff] %v1741_v8 }
 0x10f   : > { %697 = vst [vmem:[#allocation2 + $0x18] sm:$0xff] %v1743_v12 }
 0x110   : > { %698 = vst [vmem:[#allocation2 + $0x50] sm:$0xff] %v1745_v14 }
 0x111   : > { %699 = vst [vmem:[#allocation2 + $0x68] sm:$0xff] %v1747_v18 }
 0x112   : > { %700 = vst [vmem:[#allocation2 + $0x8] sm:$0xff] %v1749_v20 }
 0x113   : > { %701 = vst [vmem:[#allocation2 + $0x48] sm:$0xff] %v1751_v24 }
 0x114   : > { %702 = vst [vmem:[#allocation2 + $0x40] sm:$0xff] %v1753_v26 }
 0x115   : > { %703 = vst [vmem:[#allocation2 + $0x20] sm:$0xff] %v1755_v30 }
 0x116   : > { %704 = vst [vmem:[#allocation2 + $0x10] sm:$0xff] %v1757_v32 }
 0x117   : > { %705 = vst [vmem:[#allocation2 + $0x38] sm:$0xff] %v1759_v36 }
 0x118   : > { %706 = vst [vmem:[#allocation2 + $0x60] sm:$0xff] %v1761_v38 }
 0x119   : > { %707 = vst [vmem:[#allocation2 + $0x70] sm:$0xff] %v1763_v42 }
 0x11a   : > { %708 = vst [vmem:[#allocation2 + $0x78] sm:$0xff] %v1765_v44 }
 0x11b   : > { %709 = vst [vmem:[#allocation2 + $0x28] sm:$0xff] %v1767_v47 }
 0x11c PF: > { %p1292_p13 = scmp.eq.s32.totalorder %s1529_s20, 0 }
 0x11e   : > { %713 = sbr.rel (%p1292_p13) target bundleno = 310 (0x136), region = 86 }
 0x123   : > { %v714_v48 = vld [vmem:[#allocation2 + $0x30] sm:$0xff]  ;;  %v715_v49 = vld [vmem:[#allocation2] sm:$0xff]  ;;  %v716_v50 = vld [vmem:[#allocation2 + $0x58] sm:$0xff] }
 0x124   : > { %v730_v51 = vadd.f32 %v714_v48, %v1737_v2  ;;  %v731_v52 = vadd.f32 %v715_v49, %v1739_v6  ;;  %v732_v53 = vadd.f32 %v716_v50, %v1741_v8  ;;  %v717_v54 = vld [vmem:[#allocation2 + $0x18] sm:$0xff]  ;;  %v718_v55 = vld [vmem:[#allocation2 + $0x50] sm:$0xff]  ;;  %v719_v56 = vld [vmem:[#allocation2 + $0x68] sm:$0xff] }
 0x125   : > { %v733_v57 = vadd.f32 %v717_v54, %v1743_v12  ;;  %v720_v58 = vld [vmem:[#allocation2 + $0x8] sm:$0xff]  ;;  %v734_v59 = vadd.f32 %v718_v55, %v1745_v14  ;;  %v735_v61 = vadd.f32 %v719_v56, %v1747_v18  ;;  %v722_v62 = vld [vmem:[#allocation2 + $0x40] sm:$0xff]  ;;  %v724_v2 = vld [vmem:[#allocation2 + $0x10] sm:$0xff] }
 0x126   : > { %746 = vst [vmem:[#allocation2 + $0x30] sm:$0xff] %v730_v51  ;;  %v721_v60 = vld [vmem:[#allocation2 + $0x48] sm:$0xff]  ;;  %v736_v63 = vadd.f32 %v720_v58, %v1749_v20  ;;  %v723_v0 = vld [vmem:[#allocation2 + $0x20] sm:$0xff]  ;;  %v738_v3 = vadd.f32 %v722_v62, %v1753_v26  ;;  %v725_v4 = vld [vmem:[#allocation2 + $0x38] sm:$0xff]  ;;  %v740_v7 = vadd.f32 %v724_v2, %v1757_v32 }
 0x127   : > { %747 = vst [vmem:[#allocation2] sm:$0xff] %v731_v52  ;;  %v737_v1 = vadd.f32 %v721_v60, %v1751_v24  ;;  %v739_v5 = vadd.f32 %v723_v0, %v1755_v30  ;;  %v726_v6 = vld [vmem:[#allocation2 + $0x60] sm:$0xff]  ;;  %v727_v8 = vld [vmem:[#allocation2 + $0x70] sm:$0xff]  ;;  %v741_v9 = vadd.f32 %v725_v4, %v1759_v36  ;;  %v728_v10 = vld [vmem:[#allocation2 + $0x78] sm:$0xff] }
 0x128   : > { %748 = vst [vmem:[#allocation2 + $0x58] sm:$0xff] %v732_v53  ;;  %v742_v11 = vadd.f32 %v726_v6, %v1761_v38  ;;  %v729_v12 = vld [vmem:[#allocation2 + $0x28] sm:$0xff]  ;;  %v743_v13 = vadd.f32 %v727_v8, %v1763_v42  ;;  %v744_v14 = vadd.f32 %v728_v10, %v1765_v44 }
 0x129   : > { %749 = vst [vmem:[#allocation2 + $0x18] sm:$0xff] %v733_v57  ;;  %v745_v15 = vadd.f32 %v729_v12, %v1767_v47 }
 0x12a   : > { %750 = vst [vmem:[#allocation2 + $0x50] sm:$0xff] %v734_v59 }
 0x12b   : > { %751 = vst [vmem:[#allocation2 + $0x68] sm:$0xff] %v735_v61 }
 0x12c   : > { %752 = vst [vmem:[#allocation2 + $0x8] sm:$0xff] %v736_v63 }
 0x12d   : > { %753 = vst [vmem:[#allocation2 + $0x48] sm:$0xff] %v737_v1 }
 0x12e   : > { %754 = vst [vmem:[#allocation2 + $0x40] sm:$0xff] %v738_v3 }
 0x12f   : > { %755 = vst [vmem:[#allocation2 + $0x20] sm:$0xff] %v739_v5 }
 0x130   : > { %756 = vst [vmem:[#allocation2 + $0x10] sm:$0xff] %v740_v7 }
 0x131   : > { %757 = vst [vmem:[#allocation2 + $0x38] sm:$0xff] %v741_v9 }
 0x132   : > { %758 = vst [vmem:[#allocation2 + $0x60] sm:$0xff] %v742_v11 }
 0x133   : > { %759 = vst [vmem:[#allocation2 + $0x70] sm:$0xff] %v743_v13 }
 0x134   : > { %760 = vst [vmem:[#allocation2 + $0x78] sm:$0xff] %v744_v14 }
 0x135   : > { %761 = vst [vmem:[#allocation2 + $0x28] sm:$0xff] %v745_v15 }
 0x136 PF: > { %p1293_p0 = scmp.ne.s32.totalorder %s1529_s20, 1 }
 0x138   : > { %765 = sbr.rel (%p1293_p0) target bundleno = 510 (0x1fe), region = 90 }
 0x13d   : > { %v1409_v16 = vld [vmem:[%s1910_s3 + $0x38] sm:$0xff]  ;;  %v1408_v18 = vld [vmem:[%s1910_s3 + $0x30] sm:$0xff]  ;;  %v1407_v20 = vld [vmem:[%s1910_s3 + $0x28] sm:$0xff] }
 0x13e   : > { %v1417_v17 = vld [vmem:[%s1910_s3 + $0x78] sm:$0xff]  ;;  %960 = vmatpush.bf16.msra.mxu0 %v1409_v16  ;;  %1418 = vmatpush.bf16.msra.mxu2 %v1409_v16  ;;  %v1416_v19 = vld [vmem:[%s1910_s3 + $0x70] sm:$0xff]  ;;  %v1415_v21 = vld [vmem:[%s1910_s3 + $0x68] sm:$0xff] }
 0x13f   : > { %989 = vmatpush.bf16.msra.mxu1 %v1417_v17  ;;  %1426 = vmatpush.bf16.msra.mxu3 %v1417_v17  ;;  %v1406_v22 = vld [vmem:[%s1910_s3 + $0x20] sm:$0xff]  ;;  %v1405_v25 = vld [vmem:[%s1910_s3 + $0x18] sm:$0xff]  ;;  %v1404_v27 = vld [vmem:[%s1910_s3 + $0x10] sm:$0xff] }
 0x140   : > { %v1414_v23 = vld [vmem:[%s1910_s3 + $0x60] sm:$0xff]  ;;  %v1413_v26 = vld [vmem:[%s1910_s3 + $0x58] sm:$0xff]  ;;  %v1412_v29 = vld [vmem:[%s1910_s3 + $0x50] sm:$0xff] }
 0x141   : > { %v782_v24 = vld [vmem:[%s1909_s2] sm:$0x3]  ;;  %v766_v30 = vld [vmem:[#allocation2 + $0x30] sm:$0xff]  ;;  %v768_v31 = vld [vmem:[#allocation2 + $0x58] sm:$0xff] }
 0x142   : > { %961 = vmatpush.bf16.msra.mxu0 %v1408_v18  ;;  %1419 = vmatpush.bf16.msra.mxu2 %v1408_v18  ;;  %v1840_v28 = vperm.slane %v782_v24, 0  ;;  %v1845_v32 = vperm.slane %v782_v24, 1  ;;  %v774_v33 = vld [vmem:[#allocation2 + $0x40] sm:$0xff]  ;;  %v776_v34 = vld [vmem:[#allocation2 + $0x10] sm:$0xff]  ;;  %v769_v36 = vld [vmem:[#allocation2 + $0x18] sm:$0xff] }
 0x143   : > { %990 = vmatpush.bf16.msra.mxu1 %v1416_v19  ;;  %1427 = vmatpush.bf16.msra.mxu3 %v1416_v19  ;;  %v767_v35 = vld [vmem:[#allocation2] sm:$0xff]  ;;  %v777_v38 = vld [vmem:[#allocation2 + $0x38] sm:$0xff]  ;;  %v1403_v44 = vld [vmem:[%s1910_s3 + $0x8] sm:$0xff] }
 0x144   : > { %v775_v37 = vld [vmem:[#allocation2 + $0x20] sm:$0xff]  ;;  %v788_v39 = vadd.f32 %v1840_v28, %v766_v30  ;;  %v790_v40 = vadd.f32 %v1840_v28, %v768_v31  ;;  %v796_v41 = vadd.f32 %v1840_v28, %v774_v33  ;;  %v798_v42 = vadd.f32 %v1840_v28, %v776_v34  ;;  %v1411_v48 = vld [vmem:[%s1910_s3 + $0x48] sm:$0xff]  ;;  %v770_v63 = vld [vmem:[#allocation2 + $0x50] sm:$0xff] }
 0x145   : > { %v789_v43 = vadd.f32 %v1845_v32, %v767_v35  ;;  %v791_v45 = vadd.f32 %v1845_v32, %v769_v36  ;;  %v797_v46 = vadd.f32 %v1845_v32, %v775_v37  ;;  %v799_v47 = vadd.f32 %v1845_v32, %v777_v38  ;;  %v1402_v53 = vld [vmem:[%s1910_s3] sm:$0xff]  ;;  %v772_v0 = vld [vmem:[#allocation2 + $0x8] sm:$0xff]  ;;  %v780_v2 = vld [vmem:[#allocation2 + $0x78] sm:$0xff] }
 0x146   : > { %962 = vmatpush.bf16.msra.mxu0 %v1407_v20  ;;  %1420 = vmatpush.bf16.msra.mxu2 %v1407_v20  ;;  %v804_v49 = vmax.f32 %v788_v39, 0.0  ;;  %v806_v50 = vmax.f32 %v790_v40, 0.0  ;;  %v812_v51 = vmax.f32 %v796_v41, 0.0  ;;  %v814_v52 = vmax.f32 %v798_v42, 0.0  ;;  %v1410_v58 = vld [vmem:[%s1910_s3 + $0x40] sm:$0xff]  ;;  %v771_v3 = vld [vmem:[#allocation2 + $0x68] sm:$0xff] }
 0x147   : > { %991 = vmatpush.bf16.msra.mxu1 %v1415_v21  ;;  %1428 = vmatpush.bf16.msra.mxu3 %v1415_v21  ;;  %v805_v54 = vmax.f32 %v789_v43, 0.0  ;;  %v807_v55 = vmax.f32 %v791_v45, 0.0  ;;  %v813_v56 = vmax.f32 %v797_v46, 0.0  ;;  %v815_v57 = vmax.f32 %v799_v47, 0.0  ;;  %v778_v1 = vld [vmem:[#allocation2 + $0x60] sm:$0xff]  ;;  %v773_v4 = vld [vmem:[#allocation2 + $0x48] sm:$0xff] }
 0x148   : > { %v820_v59 = vpack.c.bf16 %v806_v50, %v804_v49  ;;  %v824_v60 = vpack.c.bf16 %v814_v52, %v812_v51  ;;  %v779_v5 = vld [vmem:[#allocation2 + $0x70] sm:$0xff]  ;;  %v781_v6 = vld [vmem:[#allocation2 + $0x28] sm:$0xff]  ;;  %v792_v7 = vadd.f32 %v1840_v28, %v770_v63  ;;  %v794_v8 = vadd.f32 %v1840_v28, %v772_v0 }
 0x149   : > { %v821_v61 = vpack.c.bf16 %v807_v55, %v805_v54  ;;  %v825_v62 = vpack.c.bf16 %v815_v57, %v813_v56  ;;  %v800_v9 = vadd.f32 %v1840_v28, %v778_v1  ;;  %v802_v10 = vadd.f32 %v1840_v28, %v780_v2 }
 0x14a   : > { %963 = vmatpush.bf16.msra.mxu0 %v1406_v22  ;;  %1421 = vmatpush.bf16.msra.mxu2 %v1406_v22  ;;  %v793_v11 = vadd.f32 %v1845_v32, %v771_v3  ;;  %v795_v12 = vadd.f32 %v1845_v32, %v773_v4  ;;  %v801_v13 = vadd.f32 %v1845_v32, %v779_v5  ;;  %v808_v15 = vmax.f32 %v792_v7, 0.0 }
 0x14b   : > { %992 = vmatpush.bf16.msra.mxu1 %v1414_v23  ;;  %1429 = vmatpush.bf16.msra.mxu3 %v1414_v23  ;;  %v803_v14 = vadd.f32 %v1845_v32, %v781_v6  ;;  %v810_v16 = vmax.f32 %v794_v8, 0.0  ;;  %v816_v17 = vmax.f32 %v800_v9, 0.0  ;;  %v818_v18 = vmax.f32 %v802_v10, 0.0 }
 0x14c   : > { %v809_v19 = vmax.f32 %v793_v11, 0.0  ;;  %v811_v20 = vmax.f32 %v795_v12, 0.0  ;;  %v817_v21 = vmax.f32 %v801_v13, 0.0 }
 0x14d   : > { %v819_v22 = vmax.f32 %v803_v14, 0.0  ;;  %v822_v23 = vpack.c.bf16 %v810_v16, %v808_v15  ;;  %v826_v24 = vpack.c.bf16 %v818_v18, %v816_v17 }
 0x14e   : > { %964 = vmatpush.bf16.msra.mxu0 %v1405_v25  ;;  %1422 = vmatpush.bf16.msra.mxu2 %v1405_v25  ;;  %v823_v25 = vpack.c.bf16 %v811_v20, %v809_v19 }
 0x14f   : > { %993 = vmatpush.bf16.msra.mxu1 %v1413_v26  ;;  %1430 = vmatpush.bf16.msra.mxu3 %v1413_v26  ;;  %v827_v26 = vpack.c.bf16 %v819_v22, %v817_v21 }
 0x152   : > { %965 = vmatpush.bf16.msra.mxu0 %v1404_v27  ;;  %1423 = vmatpush.bf16.msra.mxu2 %v1404_v27  ;;  %v1490_v27 = vld [vmem:[%s1911_s4] ss:$0 sm:$0xff] }
 0x153   : > { %994 = vmatpush.bf16.msra.mxu1 %v1412_v29  ;;  %1431 = vmatpush.bf16.msra.mxu3 %v1412_v29 }
 0x156   : > { %966 = vmatpush.bf16.msra.mxu0 %v1403_v44  ;;  %1424 = vmatpush.bf16.msra.mxu2 %v1403_v44 }
 0x157   : > { %995 = vmatpush.bf16.msra.mxu1 %v1411_v48  ;;  %1432 = vmatpush.bf16.msra.mxu3 %v1411_v48 }
 0x15a   : > { %967 = vmatpush.bf16.msra.mxu0 %v1402_v53  ;;  %1425 = vmatpush.bf16.msra.mxu2 %v1402_v53 }
 0x15b   : > { %996 = vmatpush.bf16.msra.mxu1 %v1410_v58  ;;  %1433 = vmatpush.bf16.msra.mxu3 %v1410_v58 }
 0x15d   : > { %968 = vmatmul.bf16.vlgmr.msra.gmra.mxu0 %v820_v59  ;;  %978 = vmatmul.bf16.vlgmr.msra.gmra.mxu2 %v824_v60 }
 0x15e   : > { %997 = vmatmul.bf16.vlgmr.msra.gmra.mxu1 %v821_v61  ;;  %1007 = vmatmul.bf16.vlgmr.msra.gmra.mxu3 %v825_v62 }
 0x16d   : > { %973 = vmatmul.bf16.gmra.mxu0 %v822_v23  ;;  %983 = vmatmul.bf16.gmra.mxu2 %v826_v24 }
 0x16e   : > { %1002 = vmatmul.bf16.gmra.mxu1 %v823_v25  ;;  %1012 = vmatmul.bf16.gmra.mxu3 %v827_v26 }
 0x1da   : > { %v969_v28 = vpop.f32.mrf.mxu0 }
 0x1db   : > { %v970_v29 = vadd.f32 %v1490_v27, %v969_v28  ;;  %v998_v30 = vpop.f32.mrf.mxu1 }
 0x1dd   : > { %v999_v31 = vadd.f32 %v998_v30, %v970_v29 }
 0x1df   : > { %1018 = vst [vmem:[%s1649_s10] sm:$0xff] %v999_v31 }
 0x1e0   : > { %v979_v32 = vpop.f32.mrf.mxu2 }
 0x1e1   : > { %v980_v33 = vadd.f32 %v1490_v27, %v979_v32  ;;  %v1008_v34 = vpop.f32.mrf.mxu3 }
 0x1e2   : > { %v971_v35 = vpop.f32.mrf.mxu0 }
 0x1e3   : > { %v1009_v36 = vadd.f32 %v1008_v34, %v980_v33  ;;  %v972_v37 = vadd.f32 %v1490_v27, %v971_v35  ;;  %v1000_v38 = vpop.f32.mrf.mxu1 }
 0x1e5   : > { %1022 = vst [vmem:[%s1649_s10 + $0x20] sm:$0xff] %v1009_v36  ;;  %v1001_v39 = vadd.f32 %v1000_v38, %v972_v37 }
 0x1e7   : > { %1019 = vst [vmem:[%s1649_s10 + $0x8] sm:$0xff] %v1001_v39 }
 0x1e8   : > { %v981_v40 = vpop.f32.mrf.mxu2 }
 0x1e9   : > { %v982_v41 = vadd.f32 %v1490_v27, %v981_v40  ;;  %v1010_v42 = vpop.f32.mrf.mxu3 }
 0x1ea   : > { %v974_v43 = vpop.f32.mrf.mxu0 }
 0x1eb   : > { %v1011_v44 = vadd.f32 %v1010_v42, %v982_v41  ;;  %v975_v45 = vadd.f32 %v1490_v27, %v974_v43  ;;  %v1003_v46 = vpop.f32.mrf.mxu1 }
 0x1ed   : > { %1023 = vst [vmem:[%s1649_s10 + $0x28] sm:$0xff] %v1011_v44  ;;  %v1004_v47 = vadd.f32 %v1003_v46, %v975_v45 }
 0x1ef   : > { %1020 = vst [vmem:[%s1649_s10 + $0x10] sm:$0xff] %v1004_v47 }
 0x1f0   : > { %v984_v48 = vpop.f32.mrf.mxu2 }
 0x1f1   : > { %v985_v49 = vadd.f32 %v1490_v27, %v984_v48  ;;  %v1013_v50 = vpop.f32.mrf.mxu3 }
 0x1f2   : > { %v976_v51 = vpop.f32.mrf.mxu0 }
 0x1f3   : > { %v1014_v52 = vadd.f32 %v1013_v50, %v985_v49  ;;  %v977_v53 = vadd.f32 %v1490_v27, %v976_v51  ;;  %v1005_v54 = vpop.f32.mrf.mxu1 }
 0x1f5   : > { %1024 = vst [vmem:[%s1649_s10 + $0x30] sm:$0xff] %v1014_v52  ;;  %v1006_v55 = vadd.f32 %v1005_v54, %v977_v53 }
 0x1f7   : > { %1021 = vst [vmem:[%s1649_s10 + $0x18] sm:$0xff] %v1006_v55 }
 0x1f8   : > { %v986_v56 = vpop.f32.mrf.mxu2 }
 0x1f9   : > { %v987_v57 = vadd.f32 %v1490_v27, %v986_v56  ;;  %v1015_v58 = vpop.f32.mrf.mxu3 }
 0x1fb   : > { %v1016_v59 = vadd.f32 %v1015_v58, %v987_v57 }
 0x1fd   : > { %1025 = vst [vmem:[%s1649_s10 + $0x38] sm:$0xff] %v1016_v59 }
 0x1fe PF: > { %s15_s24 = sadd.s32 1, %s1545_s24   ;;  %s1913_s18 = smov %s1525_s19 }
 0x1ff   : > { %p12_p1 = scmp.ge.s32.totalorder %s15_s24, 6   ;;  %s1914_s19 = smov %s1628_s6 }
 0x200   : > { %s1915_s20 = smov %s1537_s22  ;;  %s1916_s21 = smov %s1541_s23 }
 0x201   : > { %s1917_s22 = smov %s1920_s25  ;;  %s1918_s23 = smov %s1924_s26 }
 0x202   :  { %14 = sbr.rel (!%p12_p1) target bundleno = 4 (0x4), region = 128 }

</bundles_post_ra>
